<compile_context>
chip_gen: v7x
topology: tpu7x:2x2x1
jax: 0.10.0
libtpu: 0.0.40
codegen_flags: <defaults>
</compile_context>

<pallas_src>
import functools
import math

import jax
import jax.numpy as jnp
import numpy as np
from jax.experimental import pallas as pl
from jax.experimental.pallas import tpu as pltpu


def _xlogy(v: float) -> float:
    return v * math.log(v) if v > 0.0 else 0.0


def _cdiv(a: int, b: int) -> int:
    return -(-a // b)


# ---------------------------------------------------------------------------
# Pallas kernel
# ---------------------------------------------------------------------------
def _robust_smooth_kernel(x_ref, t_ref, ce_ref, cnt_ref, kl_ref, *,
                          pad_idx, confidence, smooth_val, kl_const,
                          inv_c, inv_log_c, n_rows, tiles_per_core, tile_rows):
    i = pl.program_id(1)

    @pl.when(i == 0)
    def _():
        ce_ref[...] = jnp.zeros_like(ce_ref)
        cnt_ref[...] = jnp.zeros_like(cnt_ref)
        kl_ref[...] = jnp.zeros_like(kl_ref)

    x = x_ref[...].astype(jnp.float32)      # (TR, C) logits, cast per tile
    t = t_ref[...]                          # (TR, 1) int32 targets
    TR, C = x.shape

    # Row validity: handles the ragged last tile and surplus (clamped) tiles.
    tile_idx = pl.program_id(0) * tiles_per_core + i
    row_ids = tile_idx * tile_rows + jax.lax.broadcasted_iota(
        jnp.int32, (TR, 1), 0)
    valid = row_ids < n_rows

    # --- stable softmax statistics (no full p / logp tensors) ---------------
    row_max = jnp.max(x, axis=-1, keepdims=True)
    shifted = x - row_max
    ex = jnp.exp(shifted)
    sum_ex = jnp.sum(ex, axis=-1, keepdims=True)
    inv_sum = pl.reciprocal(sum_ex, approx=False)
    log_sum = jnp.log(sum_ex)

    # --- one-hot of (ignore-masked) target -----------------------------------
    ignore = (t == pad_idx)                               # (TR, 1) bool
    t_masked = jnp.where(ignore, 0, t)                    # masked_fill(ignore, 0)
    col = jax.lax.broadcasted_iota(jnp.int32, (TR, C), 1)
    onehot = col == t_masked                              # (TR, C) bool

    # Gather the shifted logit at the target class; derive logp/p at target.
    shifted_tgt = jnp.sum(jnp.where(onehot, shifted, 0.0), axis=-1,
                          keepdims=True)                  # (TR, 1)
    logp_tgt = shifted_tgt - log_sum
    p_tgt = jnp.exp(logp_tgt)

    # --- cross entropy with ignore_index (mean over non-ignored) ------------
    ce_mask = jnp.logical_and(valid, jnp.logical_not(ignore))
    ce_ref[...] += jnp.sum(jnp.where(ce_mask, -logp_tgt, 0.0))
    cnt_ref[...] += jnp.sum(jnp.where(ce_mask, 1.0, 0.0))

    # --- closed-form elementwise-mean KLDiv(preds_prob, true_dist) ----------
    #   sum_c td*log(td)  = kl_const                     (compile-time const)
    #   sum_c td*p        = smooth_val + (confidence - smooth_val) * p_tgt
    kl_row = (kl_const - smooth_val
              - (confidence - smooth_val) * p_tgt) * inv_c   # (TR, 1)

    # --- per-example trust: 1 - H(p)/log(C), H from softmax statistics ------
    #   H = -sum p*logp = log_sum - inv_sum * sum(ex * shifted)
    s_xs = jnp.sum(ex * shifted, axis=-1, keepdims=True)
    H = log_sum - inv_sum * s_xs
    example_trust = 1.0 - H * inv_log_c

    kl_ref[...] += jnp.sum(jnp.where(valid, kl_row * example_trust, 0.0))


# ---------------------------------------------------------------------------
# Wrapper
# ---------------------------------------------------------------------------
def _pick_tile_rows(n_rows, n_classes, in_itemsize,
                    budget_bytes=20 * 1024 * 1024, cap=512):
    # Budget: double-buffered native-dtype input + ~4 live f32 (tr, C) temps.
    # TODO(synk): for very large vocabularies (C*4B*rows > VMEM even at tr=8),
    # a class-chunked online-softmax variant would be needed; not implemented.
    per_row = n_classes * (2 * in_itemsize + 4 * 4)
    tr = budget_bytes // max(per_row, 1)
    tr = int(min(tr, cap, n_rows))
    if tr >= 16:
        tr = (tr // 16) * 16          # bf16 sublane-packing friendly
    else:
        tr = 8
    return max(8, tr)


def robust_smooth_loss(logits, target, cur_time, *, ignore_index, alpha,
                       exp_base, transit_time_ratio, total_iterations,
                       tr=None, num_cores=2):
    """Matches RobustSmoothLoss.forward (returns a shape-(1,) array)."""
    if not exp_base > 0:
        raise ValueError("exp_base must be > 0")
    if not (0 <= cur_time <= total_iterations):
        raise ValueError("cur_time must be in [0, total_iterations]")

    B, T, C = logits.shape
    N = B * T
    if N < 8:
        raise ValueError("need at least 8 rows (B*T >= 8)")

    x = logits.reshape(N, C)                     # keep native dtype, no copy-upcast
    t = target.reshape(N, 1).astype(jnp.int32)

    if tr is None:
        tr = _pick_tile_rows(N, C, jnp.dtype(x.dtype).itemsize)
    tr = int(tr)
    tr = min(tr, max(8, (N // 8) * 8))           # block must not exceed the array
    tr = max(8, (tr // 8) * 8)

    num_tiles = _cdiv(N, tr)
    nc = int(max(1, min(num_cores, num_tiles)))  # megacore split (v7x: 2 TCs)
    tpc = _cdiv(num_tiles, nc)                   # tiles per core

    confidence = 1.0 - alpha
    smooth_val = alpha / (C - 1)
    kl_const = _xlogy(confidence) + (C - 1) * _xlogy(smooth_val)

    kernel = functools.partial(
        _robust_smooth_kernel,
        pad_idx=int(ignore_index), confidence=float(confidence),
        smooth_val=float(smooth_val), kl_const=float(kl_const),
        inv_c=float(1.0 / C), inv_log_c=float(1.0 / math.log(C)),
        n_rows=int(N), tiles_per_core=int(tpc), tile_rows=int(tr))

    def row_block(c, i):
        # Surplus tiles (when nc*tpc > num_tiles) are clamped onto the last
        # real tile; their contributions are masked out in-kernel via `valid`.
        return (jnp.minimum(c * tpc + i, num_tiles - 1), 0)

    acc_shape = jax.ShapeDtypeStruct((nc * 8, 128), jnp.float32)
    acc_spec = pl.BlockSpec((8, 128), lambda c, i: (c, 0))

    ce_acc, cnt_acc, kl_acc = pl.pallas_call(
        kernel,
        out_shape=(acc_shape, acc_shape, acc_shape),
        grid_spec=pltpu.PrefetchScalarGridSpec(
            num_scalar_prefetch=0,
            grid=(nc, tpc),
            in_specs=[
                pl.BlockSpec((tr, C), row_block),
                # TODO(synk): targets stay as a (tr, 1) column (tiny strided
                # DMA per step); a lane-dense layout needs an in-kernel
                # lane->sublane transpose and the win is marginal once the
                # logits DMA dominates.
                pl.BlockSpec((tr, 1), row_block),
            ],
            out_specs=[acc_spec, acc_spec, acc_spec],
        ),
        compiler_params=pltpu.CompilerParams(
            dimension_semantics=("parallel", "arbitrary"),
            vmem_limit_bytes=48 * 1024 * 1024),
    )(x, t)

    # Per-core partial sums live at rows 0, 8, 16, ... of each accumulator.
    ce_sum = ce_acc[::8, 0].sum()
    ce_cnt = cnt_acc[::8, 0].sum()
    kl_sum = kl_acc[::8, 0].sum()

    # NaN if every target == ignore_index — same as PyTorch CrossEntropyLoss.
    ce_loss = ce_sum / ce_cnt

    # global_trust depends only on cur_time -> computed outside the kernel and
    # factored out of the per-row epsilon product.
    time_ratio_minus_half = cur_time / total_iterations - transit_time_ratio
    global_trust = 1.0 / (1.0 + jnp.exp(-exp_base * time_ratio_minus_half))
    kl_loss = global_trust * kl_sum / N

    loss = ce_loss + kl_loss
    return loss.reshape(1)   # PyTorch returns shape (1,) (epsilon[i] broadcast)


# ---------------------------------------------------------------------------
# Pure-JAX reference for validation (mirrors the PyTorch module)
# ---------------------------------------------------------------------------
def robust_smooth_loss_ref(logits, target, cur_time, *, ignore_index, alpha,
                           exp_base, transit_time_ratio, total_iterations):
    B, T, C = logits.shape
    N = B * T
    x = logits.reshape(N, C).astype(jnp.float32)
    t = target.reshape(N)

    logp = jax.nn.log_softmax(x, axis=-1)
    p = jax.nn.softmax(x, axis=-1)

    ignore = t == ignore_index
    t_masked = jnp.where(ignore, 0, t)
    ce_per = -jnp.take_along_axis(logp, t_masked[:, None], axis=1)[:, 0]
    ce = jnp.sum(jnp.where(ignore, 0.0, ce_per)) / jnp.sum(~ignore)

    confidence = 1.0 - alpha
    onehot = jax.nn.one_hot(t_masked, C, dtype=jnp.bool_)
    td = jnp.where(onehot, confidence, alpha / (C - 1))
    kl_pt = jnp.where(td > 0, td * jnp.log(jnp.where(td > 0, td, 1.0)), 0.0) - td * p
    kl_row = kl_pt.mean(axis=-1)

    H = jnp.sum(-(p + 1e-12) * jnp.log(p + 1e-12), axis=-1)
    example_trust = 1.0 - H / jnp.log(jnp.float32(C))
    global_trust = 1.0 / (1.0 + jnp.exp(
        -exp_base * (cur_time / total_iterations - transit_time_ratio)))

    kl = global_trust * jnp.sum(kl_row * example_trust) / N
    return (ce + kl).reshape(1)


# ---------------------------------------------------------------------------
if __name__ == "__main__":
    # Small deterministic example. N = B*T = 90 with tr=32 exercises:
    #   * 3 real tiles split over a 2-"core" parallel grid axis (2x2 grid)
    #   * one surplus clamped tile (fully masked)
    #   * a ragged last tile (rows 96..119 invalid region masked)
    B, T, C = 2, 45, 32
    ignore_index = 0
    alpha = 0.1
    exp_base = 1.0
    transit_time_ratio = 0.2
    total_iterations = 100
    cur_time = 30.0

    key = jax.random.PRNGKey(0)
    k1, k2 = jax.random.split(key)
    logits = jax.random.normal(k1, (B, T, C), dtype=jnp.float32)
    target = jax.random.randint(k2, (B, T), 0, C, dtype=jnp.int32)
    # force a few padded (ignored) positions
    target = target.at[:, -3:].set(ignore_index)

    loss = robust_smooth_loss(
        logits, target, cur_time,
        ignore_index=ignore_index, alpha=alpha, exp_base=exp_base,
        transit_time_ratio=transit_time_ratio,
        total_iterations=total_iterations, tr=32)
    loss = jax.block_until_ready(loss)

    loss_ref = robust_smooth_loss_ref(
        logits, target, cur_time,
        ignore_index=ignore_index, alpha=alpha, exp_base=exp_base,
        transit_time_ratio=transit_time_ratio,
        total_iterations=total_iterations)

    np.testing.assert_allclose(np.asarray(loss), np.asarray(loss_ref),
                               rtol=1e-5, atol=1e-5)
    print("KERNEL_OK")
</pallas_src>

<mosaic_0001>
module attributes {stable_mosaic.version = 11 : i64} {
  func.func @_robust_smooth_kernel(%arg0: i32, %arg1: i32, %arg2: memref<32x32xf32, #tpu.memory_space<vmem>>, %arg3: memref<32x1xi32, #tpu.memory_space<vmem>>, %arg4: memref<8x128xf32, #tpu.memory_space<vmem>>, %arg5: memref<8x128xf32, #tpu.memory_space<vmem>>, %arg6: memref<8x128xf32, #tpu.memory_space<vmem>>) attributes {dimension_semantics = [#tpu.dimension_semantics<parallel>, #tpu.dimension_semantics<arbitrary>], iteration_bounds = array<i64: 2, 2>, scalar_prefetch = 0 : i64, scratch_operands = 0 : i64, tpu.core_type = #tpu.core_type<tc>, window_params = [{transform_indices = @transform_0, window_bounds = array<i64: 32, 32>}, {transform_indices = @transform_1, window_bounds = array<i64: 32, 1>}, {transform_indices = @transform_2, window_bounds = array<i64: 8, 128>}, {transform_indices = @transform_3, window_bounds = array<i64: 8, 128>}, {transform_indices = @transform_4, window_bounds = array<i64: 8, 128>}]} {
    %c0_i32 = arith.constant 0 : i32
    %0 = arith.cmpi eq, %arg1, %c0_i32 : i32
    %1 = arith.extui %0 : i1 to i32
    %c0_i32_0 = arith.constant 0 : i32
    %2 = arith.cmpi ne, %1, %c0_i32_0 : i32
    scf.if %2 {
      %cst_36 = arith.constant 0.000000e+00 : f32
      %86 = vector.broadcast %cst_36 : f32 to vector<8x128xf32>
      %c0_37 = arith.constant 0 : index
      %c0_38 = arith.constant 0 : index
      %87 = vector.load %arg4[%c0_37, %c0_38] : memref<8x128xf32, #tpu.memory_space<vmem>>, vector<8x128xf32>
      tpu.vector_store %arg4[%c0_37, %c0_38], %86 {strides = array<i32>} : memref<8x128xf32, #tpu.memory_space<vmem>>, vector<8x128xf32>,
      %cst_39 = arith.constant 0.000000e+00 : f32
      %88 = vector.broadcast %cst_39 : f32 to vector<8x128xf32>
      %c0_40 = arith.constant 0 : index
      %c0_41 = arith.constant 0 : index
      %89 = vector.load %arg5[%c0_40, %c0_41] : memref<8x128xf32, #tpu.memory_space<vmem>>, vector<8x128xf32>
      tpu.vector_store %arg5[%c0_40, %c0_41], %88 {strides = array<i32>} : memref<8x128xf32, #tpu.memory_space<vmem>>, vector<8x128xf32>,
      %cst_42 = arith.constant 0.000000e+00 : f32
      %90 = vector.broadcast %cst_42 : f32 to vector<8x128xf32>
      %c0_43 = arith.constant 0 : index
      %c0_44 = arith.constant 0 : index
      %91 = vector.load %arg6[%c0_43, %c0_44] : memref<8x128xf32, #tpu.memory_space<vmem>>, vector<8x128xf32>
      tpu.vector_store %arg6[%c0_43, %c0_44], %90 {strides = array<i32>} : memref<8x128xf32, #tpu.memory_space<vmem>>, vector<8x128xf32>,
    } else {
    }
    %c0 = arith.constant 0 : index
    %c0_1 = arith.constant 0 : index
    %3 = vector.load %arg2[%c0, %c0_1] : memref<32x32xf32, #tpu.memory_space<vmem>>, vector<32x32xf32>
    %c0_2 = arith.constant 0 : index
    %c0_3 = arith.constant 0 : index
    %4 = vector.load %arg3[%c0_2, %c0_3] : memref<32x1xi32, #tpu.memory_space<vmem>>, vector<32x1xi32>
    %c2_i32 = arith.constant 2 : i32
    %5 = arith.muli %arg0, %c2_i32 : i32
    %6 = arith.addi %5, %arg1 : i32
    %c32_i32 = arith.constant 32 : i32
    %7 = arith.muli %6, %c32_i32 : i32
    %8 = tpu.iota {dimensions = array<i32: 0>} : vector<32x1xi32>
    %9 = vector.broadcast %7 : i32 to vector<32x1xi32>
    %10 = arith.addi %9, %8 : vector<32x1xi32>
    %c90_i32 = arith.constant 90 : i32
    %11 = vector.broadcast %c90_i32 : i32 to vector<32x1xi32>
    %12 = arith.cmpi slt, %10, %11 : vector<32x1xi32>
    %cst = arith.constant dense<0xFF800000> : vector<32xf32>
    %13 = vector.multi_reduction <maximumf>, %3, %cst [1] : vector<32x32xf32> to vector<32xf32>
    %14 = vector.shape_cast %13 : vector<32xf32> to vector<32x1xf32>
    %15 = vector.broadcast %14 : vector<32x1xf32> to vector<32x32xf32>
    %16 = arith.subf %3, %15 : vector<32x32xf32>
    %17 = math.exp %16 : vector<32x32xf32>
    %cst_4 = arith.constant dense<0.000000e+00> : vector<32xf32>
    %18 = vector.multi_reduction <add>, %17, %cst_4 [1] : vector<32x32xf32> to vector<32xf32>
    %19 = vector.shape_cast %18 : vector<32xf32> to vector<32x1xf32>
    %20 = tpu.reciprocal %19 : vector<32x1xf32> -> vector<32x1xf32>
    %21 = math.log %19 : vector<32x1xf32>
    %c0_i32_5 = arith.constant 0 : i32
    %22 = vector.broadcast %c0_i32_5 : i32 to vector<32x1xi32>
    %23 = arith.cmpi eq, %4, %22 : vector<32x1xi32>
    %c0_i32_6 = arith.constant 0 : i32
    %24 = vector.broadcast %c0_i32_6 : i32 to vector<32x1xi32>
    %25 = arith.select %23, %24, %4 : vector<32x1xi1>, vector<32x1xi32>
    %26 = tpu.iota {dimensions = array<i32: 1>} : vector<32x32xi32>
    %27 = vector.broadcast %25 : vector<32x1xi32> to vector<32x32xi32>
    %28 = arith.cmpi eq, %26, %27 : vector<32x32xi32>
    %cst_7 = arith.constant 0.000000e+00 : f32
    %29 = vector.broadcast %cst_7 : f32 to vector<32x32xf32>
    %30 = arith.select %28, %16, %29 : vector<32x32xi1>, vector<32x32xf32>
    %cst_8 = arith.constant dense<0.000000e+00> : vector<32xf32>
    %31 = vector.multi_reduction <add>, %30, %cst_8 [1] : vector<32x32xf32> to vector<32xf32>
    %32 = vector.shape_cast %31 : vector<32xf32> to vector<32x1xf32>
    %33 = arith.subf %32, %21 : vector<32x1xf32>
    %34 = math.exp %33 : vector<32x1xf32>
    %cst_9 = arith.constant dense<true> : vector<32x1xi1>
    %35 = arith.xori %23, %cst_9 : vector<32x1xi1>
    %36 = arith.andi %12, %35 : vector<32x1xi1>
    %c0_10 = arith.constant 0 : index
    %c0_11 = arith.constant 0 : index
    %37 = vector.load %arg4[%c0_10, %c0_11] : memref<8x128xf32, #tpu.memory_space<vmem>>, vector<8x128xf32>
    %cst_12 = arith.constant 0.000000e+00 : f32
    %38 = vector.broadcast %cst_12 : f32 to vector<32x1xf32>
    %39 = arith.subf %38, %33 : vector<32x1xf32>
    %cst_13 = arith.constant 0.000000e+00 : f32
    %40 = vector.broadcast %cst_13 : f32 to vector<32x1xf32>
    %41 = arith.select %36, %39, %40 : vector<32x1xi1>, vector<32x1xf32>
    %42 = vector.shape_cast %41 : vector<32x1xf32> to vector<1x32x1xf32>
    %cst_14 = arith.constant dense<0.000000e+00> : vector<1xf32>
    %43 = vector.multi_reduction <add>, %42, %cst_14 [1, 2] : vector<1x32x1xf32> to vector<1xf32>
    %44 = vector.shape_cast %43 : vector<1xf32> to vector<1x1x1xf32>
    %45 = vector.extract %44[0, 0, 0] : f32 from vector<1x1x1xf32>
    %46 = vector.broadcast %45 : f32 to vector<8x128xf32>
    %47 = arith.addf %37, %46 : vector<8x128xf32>
    %c0_15 = arith.constant 0 : index
    %c0_16 = arith.constant 0 : index
    %48 = vector.load %arg4[%c0_15, %c0_16] : memref<8x128xf32, #tpu.memory_space<vmem>>, vector<8x128xf32>
    tpu.vector_store %arg4[%c0_15, %c0_16], %47 {strides = array<i32>} : memref<8x128xf32, #tpu.memory_space<vmem>>, vector<8x128xf32>,
    %c0_17 = arith.constant 0 : index
    %c0_18 = arith.constant 0 : index
    %49 = vector.load %arg5[%c0_17, %c0_18] : memref<8x128xf32, #tpu.memory_space<vmem>>, vector<8x128xf32>
    %cst_19 = arith.constant 1.000000e+00 : f32
    %cst_20 = arith.constant 0.000000e+00 : f32
    %50 = vector.broadcast %cst_19 : f32 to vector<32x1xf32>
    %51 = vector.broadcast %cst_20 : f32 to vector<32x1xf32>
    %52 = arith.select %36, %50, %51 : vector<32x1xi1>, vector<32x1xf32>
    %53 = vector.shape_cast %52 : vector<32x1xf32> to vector<1x32x1xf32>
    %cst_21 = arith.constant dense<0.000000e+00> : vector<1xf32>
    %54 = vector.multi_reduction <add>, %53, %cst_21 [1, 2] : vector<1x32x1xf32> to vector<1xf32>
    %55 = vector.shape_cast %54 : vector<1xf32> to vector<1x1x1xf32>
    %56 = vector.extract %55[0, 0, 0] : f32 from vector<1x1x1xf32>
    %57 = vector.broadcast %56 : f32 to vector<8x128xf32>
    %58 = arith.addf %49, %57 : vector<8x128xf32>
    %c0_22 = arith.constant 0 : index
    %c0_23 = arith.constant 0 : index
    %59 = vector.load %arg5[%c0_22, %c0_23] : memref<8x128xf32, #tpu.memory_space<vmem>>, vector<8x128xf32>
    tpu.vector_store %arg5[%c0_22, %c0_23], %58 {strides = array<i32>} : memref<8x128xf32, #tpu.memory_space<vmem>>, vector<8x128xf32>,
    %cst_24 = arith.constant 0.896774172 : f32
    %60 = vector.broadcast %cst_24 : f32 to vector<32x1xf32>
    %61 = arith.mulf %60, %34 : vector<32x1xf32>
    %cst_25 = arith.constant -0.671707511 : f32
    %62 = vector.broadcast %cst_25 : f32 to vector<32x1xf32>
    %63 = arith.subf %62, %61 : vector<32x1xf32>
    %cst_26 = arith.constant 3.125000e-02 : f32
    %64 = vector.broadcast %cst_26 : f32 to vector<32x1xf32>
    %65 = arith.mulf %63, %64 : vector<32x1xf32>
    %66 = arith.mulf %17, %16 : vector<32x32xf32>
    %cst_27 = arith.constant dense<0.000000e+00> : vector<32xf32>
    %67 = vector.multi_reduction <add>, %66, %cst_27 [1] : vector<32x32xf32> to vector<32xf32>
    %68 = vector.shape_cast %67 : vector<32xf32> to vector<32x1xf32>
    %69 = arith.mulf %20, %68 : vector<32x1xf32>
    %70 = arith.subf %21, %69 : vector<32x1xf32>
    %cst_28 = arith.constant 0.288539022 : f32
    %71 = vector.broadcast %cst_28 : f32 to vector<32x1xf32>
    %72 = arith.mulf %70, %71 : vector<32x1xf32>
    %cst_29 = arith.constant 1.000000e+00 : f32
    %73 = vector.broadcast %cst_29 : f32 to vector<32x1xf32>
    %74 = arith.subf %73, %72 : vector<32x1xf32>
    %c0_30 = arith.constant 0 : index
    %c0_31 = arith.constant 0 : index
    %75 = vector.load %arg6[%c0_30, %c0_31] : memref<8x128xf32, #tpu.memory_space<vmem>>, vector<8x128xf32>
    %76 = arith.mulf %65, %74 : vector<32x1xf32>
    %cst_32 = arith.constant 0.000000e+00 : f32
    %77 = vector.broadcast %cst_32 : f32 to vector<32x1xf32>
    %78 = arith.select %12, %76, %77 : vector<32x1xi1>, vector<32x1xf32>
    %79 = vector.shape_cast %78 : vector<32x1xf32> to vector<1x32x1xf32>
    %cst_33 = arith.constant dense<0.000000e+00> : vector<1xf32>
    %80 = vector.multi_reduction <add>, %79, %cst_33 [1, 2] : vector<1x32x1xf32> to vector<1xf32>
    %81 = vector.shape_cast %80 : vector<1xf32> to vector<1x1x1xf32>
    %82 = vector.extract %81[0, 0, 0] : f32 from vector<1x1x1xf32>
    %83 = vector.broadcast %82 : f32 to vector<8x128xf32>
    %84 = arith.addf %75, %83 : vector<8x128xf32>
    %c0_34 = arith.constant 0 : index
    %c0_35 = arith.constant 0 : index
    %85 = vector.load %arg6[%c0_34, %c0_35] : memref<8x128xf32, #tpu.memory_space<vmem>>, vector<8x128xf32>
    tpu.vector_store %arg6[%c0_34, %c0_35], %84 {strides = array<i32>} : memref<8x128xf32, #tpu.memory_space<vmem>>, vector<8x128xf32>,
    return
  }
  func.func @transform_0(%arg0: i32, %arg1: i32) -> (i32, i32) {
    %c2_i32 = arith.constant 2 : i32
    %0 = arith.muli %arg0, %c2_i32 : i32
    %1 = arith.addi %0, %arg1 : i32
    %c2_i32_0 = arith.constant 2 : i32
    %2 = arith.minsi %1, %c2_i32_0 : i32
    %c0_i32 = arith.constant 0 : i32
    %c0_i32_1 = arith.constant 0 : i32
    return %2, %c0_i32 : i32, i32
  }
  func.func @transform_1(%arg0: i32, %arg1: i32) -> (i32, i32) {
    %c2_i32 = arith.constant 2 : i32
    %0 = arith.muli %arg0, %c2_i32 : i32
    %1 = arith.addi %0, %arg1 : i32
    %c2_i32_0 = arith.constant 2 : i32
    %2 = arith.minsi %1, %c2_i32_0 : i32
    %c0_i32 = arith.constant 0 : i32
    %c0_i32_1 = arith.constant 0 : i32
    return %2, %c0_i32 : i32, i32
  }
  func.func @transform_2(%arg0: i32, %arg1: i32) -> (i32, i32) {
    %c0_i32 = arith.constant 0 : i32
    %c0_i32_0 = arith.constant 0 : i32
    return %arg0, %c0_i32 : i32, i32
  }
  func.func @transform_3(%arg0: i32, %arg1: i32) -> (i32, i32) {
    %c0_i32 = arith.constant 0 : i32
    %c0_i32_0 = arith.constant 0 : i32
    return %arg0, %c0_i32 : i32, i32
  }
  func.func @transform_4(%arg0: i32, %arg1: i32) -> (i32, i32) {
    %c0_i32 = arith.constant 0 : i32
    %c0_i32_0 = arith.constant 0 : i32
    return %arg0, %c0_i32 : i32, i32
  }
}

</mosaic_0001>

<bundles_post_ra>
// kernel: tpu_custom_call.1
= control target key start
LH: loop header
LB: loop body
LE: loop exit
PB: predicated region body
PF: predicated region fallthrough
CT: control target
= control target key end

     0   :  { %s1452_s0 = inlined_call_operand.vmem [shape: f32[90,32], index: 0, kind: input, shape index: {}]   ;;  %s1453_s1 = inlined_call_operand.vmem [shape: s32[90,1], index: 1, kind: input, shape index: {}]   ;;  %s1454_s2 = inlined_call_operand.hbm [shape: f32[16,128], index: 2, kind: output, shape index: {0}]   ;;  %s1455_s3 = inlined_call_operand.hbm [shape: f32[16,128], index: 3, kind: output, shape index: {1}]   ;;  %s1456_s4 = inlined_call_operand.hbm [shape: f32[16,128], index: 4, kind: output, shape index: {2}]  }
   0x1   :  { %1461 = sst [smem:[#allocation10_spill]] %s1452_s0 }
   0x2   :  { %10 = vsyncpa [#allocation3], 0 }
   0x3   :  { %12 = vsyncpa [#allocation3 + $0x1], 0 }
   0x4   :  { %13 = vsyncpa [#allocation5], 0 }
   0x5   :  { %15 = vsyncpa [#allocation5 + $0x1], 0  ;;  %s1105_s15 = smov 0   ;;  %s1107_s16 = smov 0  }
   0x6   :  { %s1109_s17 = smov 0   ;;  %s1111_s18 = smov 0  }
   0x7   :  { %s1113_s19 = smov 0   ;;  %s1115_s20 = smov 0  }
   0x8   :  { %s1117_s21 = smov 0   ;;  %s1119_s22 = smov 0  }
   0x9 LB: > { %s1458_s23 = sadd.s32 4294967295, %s1071_s22   ;;  %s1457_s24 = sadd.s32 4294967294, %s1071_s22   ;;  %s1071_s22 = sphi %s1119_s22, %s21_s22   ;;  %s1067_s21 = sphi %s1117_s21, %s1484_s21   ;;  %s1063_s20 = sphi %s1115_s20, %s1483_s20   ;;  %s1059_s19 = sphi %s1113_s19, %s1482_s19   ;;  %s1055_s18 = sphi %s1111_s18, %s1481_s18   ;;  %s1051_s17 = sphi %s1109_s17, %s1480_s17   ;;  %s1047_s16 = sphi %s1107_s16, %s1479_s16   ;;  %s1043_s15 = sphi %s1105_s15, %s1478_s15  }
   0xa   : > { %s30_s25 = sadd.s32 1, %s1063_s20  ;;  %s33_s26 = sadd.s32 1, %s1067_s21 }
   0xb   : > { %p31_p0 = scmp.ge.s32.totalorder %s30_s25, 2  ;;  %p118_p1 = scmp.ne.s32.totalorder %s1051_s17, %s1047_s16 }
   0xc   : > { %p119_p2 = scmp.eq.s32.totalorder %s1458_s23, 3  ;;  %p124_p4 = scmp.ne.s32.totalorder %s1047_s16, %s1043_s15 }
   0xd   : > { %s1486_s25 = smov (%p31_p0, %s30_s25), 0  ;;  %s1488_s26 = smov (!%p31_p0, %s33_s26), %s1067_s21 }
   0xe   : > { %p1156_p3 = por %p119_p2, %p118_p1  ;;  %p35_p5 = scmp.ge.s32.totalorder %s1488_s26, 2 }
   0xf   : > { %p125_p6 = scmp.eq.s32.totalorder %s1457_s24, 3  ;;  %p771_p7 = scmp.ge.s32.totalorder %s1071_s22, 1 }
  0x10   : > { %p229_p8 = scmp.lt.s32.totalorder %s1071_s22, 5  ;;  %s1490_s26 = smov (%p35_p5, %s1488_s26), 0 }
  0x11   : > { %1463 = sst [smem:[#allocation9_spill]] %s1490_s26  ;;  %p1168_p9 = por %p125_p6, %p124_p4 }
  0x12   : > { %p230_p10 = pnand %p771_p7, %p229_p8  ;;  %s105_s29 = ssub.s32 %s1067_s21, %s1490_s26 }
  0x13   : > { %s108_s30 = sadd.s32 1, %s1051_s17  ;;  %p106_p11 = scmp.eq.s32.totalorder %s105_s29, 0 }
  0x14   : > { %233 = sbr.rel (%p230_p10) target bundleno = 641 (0x281), region = 28  ;;  %s1459_s6 = sand.u32 (!%p230_p10), 1, %s1047_s16  }
  0x15   : > { %s1176_s5 = scalar_select %p106_p11, %s1051_s17, %s108_s30  }
  0x16   : > { %s775_s7 = sshll.u32 (!%p230_p10), %s1059_s19, 1  ;;  %s772_s8 = sshll.u32 (!%p230_p10), %s1459_s6, 3 }
  0x17   : > { %s1183_s9 = sadd.s32 (!%p230_p10), %s1055_s18, %s775_s7  ;;  %s1465_s0 = sld [smem:[#allocation10_spill]] (!%p230_p10) }
  0x18   : > { %p280_p12 = scmp.lt.s32.totalorder (!%p230_p10), %s1183_s9, 2  ;;  %s1195_s6 = scalar_lea.vmem (!%p230_p10), [#allocation2], %s772_s8 }
  0x19   : > { %s1197_s7 = scalar_lea.vmem (!%p230_p10), [#allocation4], %s772_s8  ;;  %s1199_s26 = scalar_lea.vmem (!%p230_p10), [#allocation6], %s772_s8 }
  0x1a   : > { %p781_p0 = scmp.ne.s32.totalorder (!%p230_p10), %s1055_s18, 0 }
  0x1b   : > { %s281_s10 = scalar_select %p280_p12, %s1183_s9, 2 }
  0x1c   : > { %309 = sbr.rel (%p781_p0) target bundleno = 35 (0x23), region = 32  ;;  %v1073_v0 = vmov (!%p781_p0), 0.0  }
  0x1d   : > { %s776_s11 = sshll.u32 %s281_s10, 2  ;;  %310 = vst [vmem:[%s1195_s6] sm:$0xff] (!%p781_p0), %v1073_v0  ;;  %311 = vst [vmem:[%s1197_s7] sm:$0xff] (!%p781_p0), %v1073_v0 }
  0x1e   : > { %p283_p13 = scmp.lt.s32.totalorder %s776_s11, 11  ;;  %312 = vst [vmem:[%s1199_s26] sm:$0xff] (!%p781_p0), %v1073_v0 }
  0x20   : > { %s1492_s11 = smov (!%p283_p13, %s776_s11), 11 }
  0x21   : > { %s777_s12 = sshll.u32 %s1492_s11, 3 }
  0x22   : > { %s286_s29 = scalar_lea.vmem %s1465_s0, %s777_s12  ;;  %s1193_s23 = scalar_lea.vmem %s1453_s1, %s777_s12 }
  0x23 PF: > { %v315_v1 = vld [vmem:[%s286_s29 + $0x10] sm:$0xff]  ;;  %vm338_vm0 = vcmask 261120   ;;  %v313_v2 = vld [vmem:[%s286_s29] sm:$0xff]  ;;  %v316_v3 = vld [vmem:[%s286_s29 + $0x18] sm:$0xff]  ;;  %v1074_v7 = vmov 0   ;;  %v324_v27 = vlaneseq  ;;  %s783_s18 = sshll.u32 %s1183_s9, 5 }
  0x24   : > { %v345_v4 = vsel %vm338_vm0, %v315_v1, -inf  ;;  %v339_v5 = vsel %vm338_vm0, %v313_v2, -inf  ;;  %v314_v6 = vld [vmem:[%s286_s29 + $0x8] sm:$0xff]  ;;  %884 = vset.pattern.permute.xlu1 %v1074_v7  ;;  %883 = vset.pattern.permute.xlu0 %v1074_v7  ;;  %v348_v8 = vsel %vm338_vm0, %v316_v3, -inf  ;;  %v1214_v11 = vld [vmem:[%s1193_s23 + $0x10] sm:$0xff]  ;;  %v1217_v12 = vld [vmem:[%s1193_s23] sm:$0xff]  ;;  %v329_v58 = vstv %s783_s18 }
  0x25   : > { %346 = vmax.xlane.f32.xlu1 %v345_v4  ;;  %340 = vmax.xlane.f32.xlu0 %v339_v5  ;;  %v342_v9 = vsel %vm338_vm0, %v314_v6, -inf  ;;  %v1210_v10 = vld [vmem:[%s1193_s23 + $0x8] sm:$0xff]  ;;  %v1222_v13 = vld [vmem:[%s1193_s23 + $0x18] sm:$0xff]  ;;  %v392_v30 = vand.u32 127, %v324_v27  ;;  %v325_v56 = vshrl.u32 %v324_v27, 7  ;;  %vm387_vm5 = vcmp.eq.s32.totalorder %v1217_v12, 0 }
  0x26   : > { %vm388_vm6 = vcmp.eq.s32.totalorder %v1210_v10, 0  ;;  %vm1075_vm8 = vmmov 1   ;;  %vm389_vm12 = vcmp.eq.s32.totalorder %v1214_v11, 0  ;;  %vm390_vm15 = vcmp.eq.s32.totalorder %v1222_v13, 0  ;;  %s1474_s23 = sadd.s32 4294967295, %s1071_s22   ;;  %s1323_s8 = sshll.u32 %s1059_s19, 7 }
  0x27   : > { %v326_v57 = vadd.s32 8, %v325_v56  ;;  %v1238_v59 = vadd.s32 %v329_v58, %v325_v56  ;;  %v327_v61 = vadd.s32 16, %v325_v56  ;;  %v328_v62 = vadd.s32 24, %v325_v56  ;;  %vm437_vm9 = vmxor %vm387_vm5, %vm1075_vm8  ;;  %s1320_s24 = sand.u32 1, %s1474_s23   ;;  %s594_s9 = sshll.u32 %s1195_s6, 4  ;;  %s1335_s9 = int_to_ptr.vmem [resolvable:$true] %s594_s9 }
  0x28   : > { %vm438_vm11 = vmxor %vm388_vm6, %vm1075_vm8  ;;  %s607_s11 = sshll.u32 %s1197_s7, 4  ;;  %s1333_s29 = scalar_lea.hbm %s1454_s2, %s1323_s8  ;;  %s1343_s11 = int_to_ptr.vmem [resolvable:$true] %s607_s11 }
  0x29   : > { %349 = vmax.xlane.f32.xlu1 %v348_v8  ;;  %343 = vmax.xlane.f32.xlu0 %v342_v9  ;;  %v1240_v60 = vadd.s32 %v329_v58, %v326_v57  ;;  %vm334_vm7 = vcmp.lt.s32.totalorder %v1238_v59, 90  ;;  %v1248_v63 = vadd.s32 %v329_v58, %v327_v61  ;;  %s1341_s18 = scalar_lea.hbm %s1455_s3, %s1323_s8  ;;  %s1475_s23 = sand.u32 1, %s1047_s16  }
  0x2a   : > { %vm1253_vm13 = vmand %vm334_vm7, %vm437_vm9  ;;  %s1077_s13 = smov [#allocation2]  }
  0x2b   : > { %vm335_vm10 = vcmp.lt.s32.totalorder %v1240_v60, 90  ;;  %s921_s14 = sshll.u32 %s1077_s13, 4  ;;  %s922_s14 = int_to_ptr.vmem [resolvable:$false] %s921_s14 }
  0x2c   : > { %vm1261_vm14 = vmand %vm335_vm10, %vm438_vm11  ;;  %s923_s0 = scalar_lea.vmem %s922_s14, 256  ;;  %p924_p5 = scmp.lt.s32.totalorder %s1335_s9, %s922_s14 }
  0x3a   : > { %397 = vperm.xlu1 %884, %v1210_v10  }
  0x3e   : > { %400 = vperm.xlu1 %884, %v1214_v11  }
  0x3f   : > { %394 = vperm.xlu0 %883, %v1217_v12  }
  0x42   : > { %403 = vperm.xlu1 %884, %v1222_v13  }
  0xb2   : > { %v347_v14 = vpop.xlane.xlu1 %346  ;;  %v341_v15 = vpop.xlane.xlu0 %340 }
  0xb3   : > { %v353_v16 = vsub.f32 %v315_v1, %v347_v14  ;;  %v351_v17 = vsub.f32 %v313_v2, %v341_v15  ;;  %v1257_v1 = vadd.s32 %v329_v58, %v328_v62 }
  0xb5   : > { %v355_v18 = vmul.f32 1.442695, %v351_v17  ;;  %v359_v19 = vmul.f32 1.442695, %v353_v16 }
  0xb6   : > { %v350_v20 = vpop.xlane.xlu1 %349  ;;  %v344_v21 = vpop.xlane.xlu0 %343 }
  0xb7   : > { %v354_v22 = vsub.f32 %v316_v3, %v350_v20  ;;  %v352_v23 = vsub.f32 %v314_v6, %v344_v21  ;;  %885 = vpow2.f32 %v355_v18  ;;  %v1076_v3 = vmov 0.0  }
  0xb8   : > { %887 = vpow2.f32 %v359_v19  ;;  %v476_v4 = vsel %vm1261_vm14, 1.0, %v1076_v3  ;;  %v475_v5 = vsel %vm1253_vm13, 1.0, %v1076_v3 }
  0xb9   : > { %v357_v24 = vmul.f32 1.442695, %v352_v23  ;;  %v361_v25 = vmul.f32 1.442695, %v354_v22 }
  0xba   : > { %v398_v26 = vpop.permute.xlu1 %397 }
  0xbb   : > { %889 = vpow2.f32 %v357_v24  ;;  %vm406_vm3 = vcmp.eq.s32.totalorder %v392_v30, %v398_v26 }
  0xbc   : > { %891 = vpow2.f32 %v361_v25  ;;  %v410_v47 = vsel %vm406_vm3, %v352_v23, 0.0  ;;  %vm454_vm3 = vcmask 7168  }
  0xbd   : > { %v416_v49 = vsel %vm338_vm0, %v410_v47, 0.0  ;;  %v479_v7 = vsel %vm454_vm3, %v475_v5, 0.0  ;;  %v480_v8 = vsel %vm454_vm3, %v476_v4, 0.0 }
  0xbe   : > { %v401_v29 = vpop.permute.xlu1 %400  ;;  %v395_v35 = vpop.permute.xlu0 %394  ;;  %v481_v10 = vadd.f32 %v480_v8, %v479_v7 }
  0xbf   : > { %vm407_vm1 = vcmp.eq.s32.totalorder %v392_v30, %v401_v29  ;;  %vm405_vm2 = vcmp.eq.s32.totalorder %v392_v30, %v395_v35 }
  0xc0   : > { %v411_v38 = vsel %vm407_vm1, %v353_v16, 0.0  ;;  %v409_v42 = vsel %vm405_vm2, %v351_v17, 0.0  ;;  %vm439_vm1 = vmxor %vm389_vm12, %vm1075_vm8 }
  0xc1   : > { %v886_v28 = vpop.eup %885  ;;  %v419_v40 = vsel %vm338_vm0, %v411_v38, 0.0  ;;  %v413_v45 = vsel %vm338_vm0, %v409_v42, 0.0  ;;  %vm440_vm2 = vmxor %vm390_vm15, %vm1075_vm8 }
  0xc2   : > { %v363_v31 = vsel %vm338_vm0, %v886_v28, 0.0  ;;  %v888_v32 = vpop.eup %887  ;;  %v510_v41 = vmul.f32 %v886_v28, %v351_v17  ;;  %v404_v43 = vpop.permute.xlu1 %403 }
  0xc3   : > { %364 = vadd.xlane.f32.xlu1 %v363_v31  ;;  %v369_v33 = vsel %vm338_vm0, %v888_v32, 0.0  ;;  %v512_v46 = vmul.f32 %v888_v32, %v353_v16  ;;  %vm408_vm4 = vcmp.eq.s32.totalorder %v392_v30, %v404_v43 }
  0xc4   : > { %v514_v44 = vsel %vm338_vm0, %v510_v41, 0.0  ;;  %v412_v50 = vsel %vm408_vm4, %v354_v22, 0.0  ;;  %vm337_vm4 = vcmp.lt.s32.totalorder %v1257_v1, 90 }
  0xc5   : > { %v890_v34 = vpop.eup %889  ;;  %v520_v48 = vsel %vm338_vm0, %v512_v46, 0.0  ;;  %v422_v51 = vsel %vm338_vm0, %v412_v50, 0.0  ;;  %vm1286_vm6 = vmand %vm337_vm4, %vm440_vm2 }
  0xc6   : > { %v366_v36 = vsel %vm338_vm0, %v890_v34, 0.0  ;;  %v892_v37 = vpop.eup %891  ;;  %v511_v52 = vmul.f32 %v890_v34, %v352_v23  ;;  %v478_v13 = vsel %vm1286_vm6, 1.0, %v1076_v3 }
  0xc7   : > { %370 = vadd.xlane.f32.xlu1 %v369_v33  ;;  %367 = vadd.xlane.f32.xlu0 %v366_v36  ;;  %v372_v39 = vsel %vm338_vm0, %v892_v37, 0.0  ;;  %v513_v54 = vmul.f32 %v892_v37, %v354_v22  ;;  %v484_v15 = vsel %vm454_vm3, %v478_v13, 0.0 }
  0xc8   : > { %v517_v53 = vsel %vm338_vm0, %v511_v52, 0.0 }
  0xc9   : > { %v523_v55 = vsel %vm338_vm0, %v513_v54, 0.0  ;;  %vm336_vm0 = vcmp.lt.s32.totalorder %v1248_v63, 90 }
  0xca   : > { %vm1276_vm5 = vmand %vm336_vm0, %vm439_vm1 }
  0xcb   : > { %373 = vadd.xlane.f32.xlu1 %v372_v39  ;;  %420 = vadd.xlane.f32.xlu0 %v419_v40  ;;  %v477_v9 = vsel %vm1276_vm5, 1.0, %v1076_v3 }
  0xcc   : > { %v482_v12 = vsel %vm454_vm3, %v477_v9, 0.0 }
  0xcd   : > { %v483_v14 = vadd.f32 %v482_v12, %v481_v10 }
  0xcf   : > { %515 = vadd.xlane.f32.xlu0 %v514_v44  ;;  %414 = vadd.xlane.f32.xlu1 %v413_v45  ;;  %v485_v16 = vadd.f32 %v484_v15, %v483_v14 }
  0xd3   : > { %521 = vadd.xlane.f32.xlu0 %v520_v48  ;;  %417 = vadd.xlane.f32.xlu1 %v416_v49 }
  0xd7   : > { %423 = vadd.xlane.f32.xlu1 %v422_v51 }
  0xdb   : > { %518 = vadd.xlane.f32.xlu1 %v517_v53 }
  0xdf   : > { %524 = vadd.xlane.f32.xlu1 %v523_v55 }
  0xe3   : > { %486 = vadd.xlane.f32.xlu1 %v485_v16 }
 0x150   : > { %v365_v17 = vpop.xlane.xlu1 %364 }
 0x151   : > { %893 = vlog2.f32 %v365_v17 }
 0x154   : > { %v371_v18 = vpop.xlane.xlu1 %370  ;;  %v368_v19 = vpop.xlane.xlu0 %367 }
 0x155   : > { %895 = vlog2.f32 %v371_v18 }
 0x156   : > { %897 = vlog2.f32 %v368_v19 }
 0x157   : > { %899 = vrcp.f32 %v365_v17 }
 0x158   : > { %v374_v20 = vpop.xlane.xlu1 %373  ;;  %v421_v21 = vpop.xlane.xlu0 %420 }
 0x159   : > { %901 = vlog2.f32 %v374_v20 }
 0x15a   : > { %903 = vrcp.f32 %v371_v18 }
 0x15b   : > { %v894_v22 = vpop.eup %893  ;;  %905 = vrcp.f32 %v368_v19 }
 0x15c   : > { %v415_v23 = vpop.xlane.xlu1 %414  ;;  %v380_v24 = vmul.f32 0.6931472, %v894_v22  ;;  %v516_v27 = vpop.xlane.xlu0 %515 }
 0x15e   : > { %v425_v25 = vsub.f32 %v415_v23, %v380_v24 }
 0x15f   : > { %v896_v26 = vpop.eup %895 }
 0x160   : > { %v418_v28 = vpop.xlane.xlu1 %417  ;;  %v384_v29 = vmul.f32 0.6931472, %v896_v26  ;;  %v429_v30 = vmul.f32 1.442695, %v425_v25  ;;  %v898_v31 = vpop.eup %897  ;;  %v446_v34 = vsub.f32 0.0, %v425_v25 }
 0x161   : > { %v900_v32 = vpop.eup %899  ;;  %v382_v35 = vmul.f32 0.6931472, %v898_v31  ;;  %v522_v44 = vpop.xlane.xlu0 %521 }
 0x162   : > { %v427_v33 = vsub.f32 %v421_v21, %v384_v29  ;;  %907 = vpow2.f32 %v429_v30  ;;  %v526_v43 = vmul.f32 %v900_v32, %v516_v27  ;;  %v450_v45 = vsel %vm1253_vm13, %v446_v34, 0.0 }
 0x163   : > { %v902_v36 = vpop.eup %901  ;;  %909 = vrcp.f32 %v374_v20  ;;  %v426_v40 = vsub.f32 %v418_v28, %v382_v35  ;;  %v455_v53 = vsel %vm454_vm3, %v450_v45, 0.0 }
 0x164   : > { %v424_v37 = vpop.xlane.xlu1 %423  ;;  %v433_v38 = vmul.f32 1.442695, %v427_v33  ;;  %v448_v39 = vsub.f32 0.0, %v427_v33  ;;  %v386_v41 = vmul.f32 0.6931472, %v902_v36  ;;  %v904_v42 = vpop.eup %903  ;;  %v530_v58 = vsub.f32 %v380_v24, %v526_v43 }
 0x165   : > { %v431_v46 = vmul.f32 1.442695, %v426_v40  ;;  %v447_v47 = vsub.f32 0.0, %v426_v40  ;;  %v528_v52 = vmul.f32 %v904_v42, %v522_v44  ;;  %v906_v57 = vpop.eup %905 }
 0x166   : > { %911 = vpow2.f32 %v433_v38  ;;  %v428_v48 = vsub.f32 %v424_v37, %v386_v41  ;;  %v452_v50 = vsel %vm1276_vm5, %v448_v39, 0.0  ;;  %v534_v10 = vmul.f32 0.28853902, %v530_v58 }
 0x167   : > { %913 = vpow2.f32 %v431_v46  ;;  %v451_v51 = vsel %vm1261_vm14, %v447_v47, 0.0  ;;  %v458_v4 = vsel %vm454_vm3, %v452_v50, 0.0  ;;  %v532_v9 = vsub.f32 %v384_v29, %v528_v52 }
 0x168   : > { %v519_v49 = vpop.xlane.xlu1 %518  ;;  %v456_v54 = vsel %vm454_vm3, %v451_v51, 0.0  ;;  %v435_v55 = vmul.f32 1.442695, %v428_v48  ;;  %v449_v56 = vsub.f32 0.0, %v428_v48  ;;  %v538_v20 = vsub.f32 1.0, %v534_v10 }
 0x169   : > { %v457_v61 = vadd.f32 %v456_v54, %v455_v53  ;;  %v527_v62 = vmul.f32 %v906_v57, %v519_v49  ;;  %v536_v11 = vmul.f32 0.28853902, %v532_v9  ;;  %v474_v9 = vld [vmem:[%s1197_s7] sm:$0xff] }
 0x16a   : > { %915 = vpow2.f32 %v435_v55  ;;  %v453_v3 = vsel %vm1286_vm6, %v449_v56, 0.0 }
 0x16b   : > { %v459_v5 = vadd.f32 %v458_v4, %v457_v61  ;;  %v460_v6 = vsel %vm454_vm3, %v453_v3, 0.0  ;;  %v531_v15 = vsub.f32 %v382_v35, %v527_v62  ;;  %v540_v29 = vsub.f32 1.0, %v536_v11 }
 0x16c   : > { %v525_v0 = vpop.xlane.xlu1 %524  ;;  %v908_v2 = vpop.eup %907 }
 0x16d   : > { %v910_v7 = vpop.eup %909  ;;  %v498_v8 = vmul.f32 0.8967742, %v908_v2  ;;  %v461_v13 = vadd.f32 %v460_v6, %v459_v5  ;;  %v535_v24 = vmul.f32 0.28853902, %v531_v15 }
 0x16e   : > { %v529_v12 = vmul.f32 %v910_v7, %v525_v0 }
 0x16f   : > { %v502_v14 = vsub.f32 -0.6717075, %v498_v8  ;;  %462 = vadd.xlane.f32.xlu0 %v461_v13  ;;  %v539_v34 = vsub.f32 1.0, %v535_v24  ;;  %v445_v8 = vld [vmem:[%s1195_s6] sm:$0xff] }
 0x170   : > { %v912_v16 = vpop.eup %911  ;;  %v533_v21 = vsub.f32 %v386_v41, %v529_v12  ;;  %v487_v60 = vpop.xlane.xlu1 %486 }
 0x171   : > { %v500_v17 = vmul.f32 0.8967742, %v912_v16  ;;  %v506_v18 = vmul.f32 0.03125, %v502_v14  ;;  %v914_v19 = vpop.eup %913  ;;  %v488_v50 = vrot.slane %v487_v60, 4 }
 0x172   : > { %v499_v23 = vmul.f32 0.8967742, %v914_v19  ;;  %v537_v31 = vmul.f32 0.28853902, %v533_v21 }
 0x173   : > { %v504_v22 = vsub.f32 -0.6717075, %v500_v17  ;;  %v543_v27 = vmul.f32 %v538_v20, %v506_v18  ;;  %v489_v63 = vadd.f32 %v488_v50, %v487_v60 }
 0x174   : > { %v916_v25 = vpop.eup %915  ;;  %v503_v28 = vsub.f32 -0.6717075, %v499_v23  ;;  %v541_v39 = vsub.f32 1.0, %v537_v31 }
 0x175   : > { %v508_v26 = vmul.f32 0.03125, %v504_v22  ;;  %v501_v30 = vmul.f32 0.8967742, %v916_v25  ;;  %v547_v37 = vsel %vm334_vm7, %v543_v27, 0.0  ;;  %v490_v51 = vrot.slane %v489_v63, 2 }
 0x176   : > { %v507_v32 = vmul.f32 0.03125, %v503_v28  ;;  %v551_v43 = vsel %vm454_vm3, %v547_v37, 0.0 }
 0x177   : > { %v545_v33 = vmul.f32 %v540_v29, %v508_v26  ;;  %v505_v35 = vsub.f32 -0.6717075, %v501_v30  ;;  %v491_v54 = vadd.f32 %v490_v51, %v489_v63 }
 0x178   : > { %v544_v36 = vmul.f32 %v539_v34, %v507_v32 }
 0x179   : > { %v509_v38 = vmul.f32 0.03125, %v505_v35  ;;  %v549_v41 = vsel %vm336_vm0, %v545_v33, 0.0  ;;  %v492_v57 = vrot.slane %v491_v54, 1 }
 0x17a   : > { %v548_v40 = vsel %vm335_vm10, %v544_v36, 0.0  ;;  %v554_v59 = vsel %vm454_vm3, %v549_v41, 0.0 }
 0x17b   : > { %v546_v42 = vmul.f32 %v541_v39, %v509_v38  ;;  %v552_v44 = vsel %vm454_vm3, %v548_v40, 0.0  ;;  %v493_v61 = vadd.f32 %v492_v57, %v491_v54 }
 0x17c   : > { %v553_v45 = vadd.f32 %v552_v44, %v551_v43 }
 0x17d   : > { %v550_v46 = vsel %vm337_vm4, %v546_v42, 0.0 }
 0x17e   : > { %v555_v47 = vadd.f32 %v554_v59, %v553_v45  ;;  %v556_v48 = vsel %vm454_vm3, %v550_v46, 0.0 }
 0x180   : > { %v557_v49 = vadd.f32 %v556_v48, %v555_v47 }
 0x182   : > { %558 = vadd.xlane.f32.xlu0 %v557_v49 }
 0x1fc   : > { %v463_v52 = vpop.xlane.xlu0 %462 }
 0x1fd   : > { %v464_v53 = vrot.slane %v463_v52, 4 }
 0x1ff   : > { %v465_v55 = vadd.f32 %v464_v53, %v463_v52 }
 0x201   : > { %v466_v56 = vrot.slane %v465_v55, 2 }
 0x203   : > { %v467_v1 = vadd.f32 %v466_v56, %v465_v55 }
 0x205   : > { %v468_v58 = vrot.slane %v467_v1, 1 }
 0x207   : > { %v469_v62 = vadd.f32 %v468_v58, %v467_v1 }
 0x209   : > { %792 = vpush %v469_v62 }
 0x20a   : > { %794 = vpush %v493_v61 }
 0x20f   : > { %v559_v0 = vpop.xlane.xlu0 %558 }
 0x210   : > { %v560_v3 = vrot.slane %v559_v0, 4 }
 0x212   : > { %v561_v4 = vadd.f32 %v560_v3, %v559_v0 }
 0x214   : > { %v562_v2 = vrot.slane %v561_v4, 2 }
 0x216   : > { %v563_v5 = vadd.f32 %v562_v2, %v561_v4 }
 0x218   : > { %v564_v6 = vrot.slane %v563_v5, 1 }
 0x21a   : > { %v565_v7 = vadd.f32 %v564_v6, %v563_v5 }
 0x21c   : > { %796 = vpush %v565_v7 }
 0x23a   : > { %s793_s10 = spop %792 }
 0x23b   : > { %v471_v10 = vstv %s793_s10  ;;  %s795_s12 = spop %794  ;;  %s571_s10 = scalar_lea.sflag [#allocation3], %s1475_s23 }
 0x23c   : > { %v472_v12 = vadd.f32 %v471_v10, %v445_v8  ;;  %v495_v13 = vstv %s795_s12  ;;  %s917_s12 = scalar_lea.vmem %s1335_s9, 128 }
 0x23d   : > { %v496_v14 = vadd.f32 %v495_v13, %v474_v9  ;;  %p918_p1 = scmp.ne.s32.totalorder %s1335_s9, %s917_s12  ;;  %p925_p6 = scmp.lt.s32.totalorder %s923_s0, %s917_s12 }
 0x23e   : > { %473 = vst [vmem:[%s1195_s6] sm:$0xff] %v472_v12 }
 0x23f   : > { %497 = vst [vmem:[%s1197_s7] sm:$0xff] %v496_v14  ;;  %p919_p2 = pnand %p918_p1, %p1156_p3  ;;  %p926_p7 = por %p925_p6, %p924_p5 }
 0x241   : > { %p920_p4 = pneg %p919_p2 }
 0x243   : > { %p927_p8 = pnand %p926_p7, %p920_p4 }
 0x245   : > { %930 = shalt.err (!%p927_p8)
}
 0x246   : > { %s931_s6 = scalar_lea.hbm %s1333_s29, 128  ;;  %s935_s30 = scalar_lea.hbm %s1454_s2, 256 }
 0x247   : > { %p932_p10 = scmp.ne.s32.totalorder %s1333_s29, %s931_s6  ;;  %p936_p13 = scmp.lt.u32.totalorder %s1333_s29, %s1454_s2 }
 0x248   : > { %p937_p0 = scmp.lt.u32.totalorder %s935_s30, %s931_s6  ;;  %p939_p2 = scmp.lt.u32.totalorder %s931_s6, %s1333_s29 }
 0x249   : > { %p933_p11 = pnand %p932_p10, %p1156_p3 }
 0x24a   : > { %p938_p1 = por %p937_p0, %p936_p13 }
 0x24b   : > { %p934_p12 = pneg %p933_p11 }
 0x24c   : > { %p940_p4 = por %p939_p2, %p938_p1 }
 0x24e   : > { %p941_p5 = pnand %p940_p4, %p934_p12 }
 0x250   : > { %944 = shalt.err (!%p941_p5)
}
 0x251   : > { %798 = dma.vmem_to_hbm [thread:$0]  (%p1156_p3), %s1335_s9, 128, %s1333_s29, %s571_s10  }
 0x252   : > { %s576_s0 = scalar_lea.sflag [#allocation5], %s1320_s24  ;;  %s945_s12 = scalar_lea.vmem %s1343_s11, 128 }
 0x253   : > { %p946_p6 = scmp.ne.s32.totalorder %s1343_s11, %s945_s12  ;;  %s1078_s14 = smov [#allocation4]  }
 0x254   : > { %s949_s6 = sshll.u32 %s1078_s14, 4  ;;  %s950_s6 = int_to_ptr.vmem [resolvable:$false] %s949_s6 }
 0x255   : > { %p947_p7 = pnand %p946_p6, %p1156_p3  ;;  %s951_s7 = scalar_lea.vmem %s950_s6, 256 }
 0x256   : > { %p952_p10 = scmp.lt.s32.totalorder %s1343_s11, %s950_s6  ;;  %p953_p11 = scmp.lt.s32.totalorder %s951_s7, %s945_s12 }
 0x257   : > { %p948_p8 = pneg %p947_p7 }
 0x258   : > { %p954_p12 = por %p953_p11, %p952_p10 }
 0x25a   : > { %p955_p13 = pnand %p954_p12, %p948_p8 }
 0x25c   : > { %958 = shalt.err (!%p955_p13)
}
 0x25d   : > { %s959_s9 = scalar_lea.hbm %s1341_s18, 128  ;;  %s963_s19 = scalar_lea.hbm %s1455_s3, 256 }
 0x25e   : > { %p960_p0 = scmp.ne.s32.totalorder %s1341_s18, %s959_s9  ;;  %p964_p4 = scmp.lt.u32.totalorder %s1341_s18, %s1455_s3 }
 0x25f   : > { %p965_p5 = scmp.lt.u32.totalorder %s963_s19, %s959_s9  ;;  %p967_p7 = scmp.lt.u32.totalorder %s959_s9, %s1341_s18 }
 0x260   : > { %p961_p1 = pnand %p960_p0, %p1156_p3 }
 0x261   : > { %p966_p6 = por %p965_p5, %p964_p4 }
 0x262   : > { %p962_p2 = pneg %p961_p1 }
 0x263   : > { %p968_p8 = por %p967_p7, %p966_p6 }
 0x265   : > { %p969_p10 = pnand %p968_p8, %p962_p2 }
 0x267   : > { %972 = shalt.err (!%p969_p10)
}
 0x268   : > { %799 = dma.vmem_to_hbm [thread:$0]  (%p1156_p3), %s1343_s11, 128, %s1341_s18, %s576_s0   ;;  %v542_v15 = vld [vmem:[%s1199_s26] sm:$0xff] }
 0x269   : > { %s620_s13 = sshll.u32 %s1199_s26, 4  ;;  %s797_s12 = spop %796  ;;  %s621_s13 = int_to_ptr.vmem [resolvable:$true] %s620_s13 }
 0x26a   : > { %v567_v16 = vstv %s797_s12  ;;  %s1400_s7 = scalar_lea.hbm %s1456_s4, %s1323_s8  ;;  %s973_s9 = scalar_lea.vmem %s621_s13, 128 }
 0x26b   : > { %v568_v17 = vadd.f32 %v567_v16, %v542_v15  ;;  %p974_p11 = scmp.ne.s32.totalorder %s621_s13, %s973_s9  ;;  %s1079_s29 = smov [#allocation6]  }
 0x26c   : > { %s977_s10 = sshll.u32 %s1079_s29, 4  ;;  %s978_s10 = int_to_ptr.vmem [resolvable:$false] %s977_s10 }
 0x26d   : > { %569 = vst [vmem:[%s1199_s26] sm:$0xff] %v568_v17  ;;  %p975_p12 = pnand %p974_p11, %p1156_p3  ;;  %s979_s11 = scalar_lea.vmem %s978_s10, 256 }
 0x26e   : > { %p980_p0 = scmp.lt.s32.totalorder %s621_s13, %s978_s10  ;;  %p981_p1 = scmp.lt.s32.totalorder %s979_s11, %s973_s9 }
 0x26f   : > { %p976_p13 = pneg %p975_p12 }
 0x270   : > { %p982_p2 = por %p981_p1, %p980_p0 }
 0x272   : > { %p983_p4 = pnand %p982_p2, %p976_p13 }
 0x274   : > { %986 = shalt.err (!%p983_p4)
}
 0x275   : > { %s987_s26 = scalar_lea.hbm %s1400_s7, 128  ;;  %s991_s19 = scalar_lea.hbm %s1456_s4, 256 }
 0x276   : > { %p988_p5 = scmp.ne.s32.totalorder %s1400_s7, %s987_s26  ;;  %p992_p8 = scmp.lt.u32.totalorder %s1400_s7, %s1456_s4 }
 0x277   : > { %p993_p10 = scmp.lt.u32.totalorder %s991_s19, %s987_s26  ;;  %p995_p12 = scmp.lt.u32.totalorder %s987_s26, %s1400_s7 }
 0x278   : > { %p989_p6 = pnand %p988_p5, %p1156_p3 }
 0x279   : > { %p994_p11 = por %p993_p10, %p992_p8 }
 0x27a   : > { %p990_p7 = pneg %p989_p6 }
 0x27b   : > { %p996_p13 = por %p995_p12, %p994_p11 }
 0x27d   : > { %p997_p0 = pnand %p996_p13, %p990_p7 }
 0x27f   : > { %1000 = shalt.err (!%p997_p0)
}
 0x280   : > { %800 = dma.vmem_to_hbm [thread:$0]  (%p1156_p3), %s621_s13, 128, %s1400_s7, %s576_s0  }
 0x281 PF: > { %p814_p1 = scmp.ge.s32.totalorder %s1071_s22, 2  ;;  %s632_s12 = sand.u32 1, %s1043_s15  }
 0x282   : > { %s633_s14 = scalar_lea.sflag [#allocation3], %s632_s12 }
 0x283   : > { %p805_p2 = pnand %p814_p1, %p1168_p9 }
 0x285   : > { %1034 = dma.done.wait (!%p805_p2), %s633_s14, 128  }
 0x286   : > { %1036 = vsyncadd (!%p805_p2), %s633_s14, 4294967168  ;;  %s1476_s6 = sadd.s32 4294967294, %s1071_s22  }
 0x287   : > { %s641_s9 = sand.u32 1, %s1476_s6  }
 0x288   : > { %s642_s29 = scalar_lea.sflag [#allocation5], %s641_s9 }
 0x289   : > { %1038 = dma.done.wait (!%p805_p2), %s642_s29, 256  }
 0x28a   : > { %1040 = vsyncadd (!%p805_p2), %s642_s29, 4294967040  ;;  %s21_s22 = sadd.s32 1, %s1071_s22   ;;  %s1477_s27 = sld [smem:[#allocation9_spill]] }
 0x28b   : > { %p18_p3 = scmp.ge.s32.totalorder %s21_s22, 6   ;;  %s1478_s15 = smov %s1047_s16 }
 0x28c   : > { %s1479_s16 = smov %s1051_s17  ;;  %s1480_s17 = smov %s1176_s5 }
 0x28d   : > { %s1481_s18 = smov %s1063_s20  ;;  %s1482_s19 = smov %s1067_s21 }
 0x28e   : > { %s1483_s20 = smov %s1486_s25  ;;  %20 = sbr.rel (!%p18_p3) target bundleno = 9 (0x9), region = 102 }
 0x290   : > { %s1484_s21 = smov %s1477_s27 }
 0x295   :  { %656 = vsyncpa [#allocation3], 1 }
 0x296   :  { %658 = vsyncpa [#allocation3 + $0x1], 1 }
 0x297   :  { %659 = vsyncpa [#allocation5], 1 }
 0x298   :  { %661 = vsyncpa [#allocation5 + $0x1], 1 }

</bundles_post_ra>
